<compile_context>
chip_gen: v7x
topology: tpu7x:2x2x1
jax: 0.10.0
libtpu: 0.0.40
codegen_flags: <defaults>
</compile_context>

<pallas_src>
from functools import partial

import jax
import jax.numpy as jnp
from jax import lax
from jax.experimental import pallas as pl
from jax.experimental.pallas import tpu as pltpu

# ---- hyperparameters (csv not available; fixed deterministically) -----------
INPUT_DIM = 5
OUTPUT_DIM = 6
NUM_LAYERS = 3          # stand-in for hyperparams['num_layers']
HIDDEN = 32             # stand-in for hyperparams['hidden_neurons']
DROPOUT_RATE = 0.1      # inactive at inference (identity)

# Padded / augmented dims (bias folded into the contraction).
IN0_PAD = 8             # input features 5 -> 8; ones row sits at index INPUT_DIM
HID_AUG = HIDDEN + 8    # hidden 32 + [ones; 7 zero rows]; bias col at index HIDDEN
OUT_PAD = 8             # output features 6 -> 8

PACK_COLS = 128
PACK_ROWS = HIDDEN * NUM_LAYERS + OUT_PAD       # 104 (multiple of 8)

HP = jax.lax.Precision.HIGHEST
_INV_SQRT2 = 0.7071067811865476


def _round_up(a, b):
    return ((a + b - 1) // b) * b


def _gelu_exact(x):
    # PyTorch nn.GELU() default = exact erf-based GELU (VALU polynomial on TPU).
    # TODO(synk): a tanh/EUP-backed approximate GELU would offload this to the
    # EUP slot but deviates from nn.GELU() default numerics, so it is not used.
    return 0.5 * x * (1.0 + lax.erf(x * _INV_SQRT2))


def _softplus(x):
    # Numerically-stable softplus: max(x,0) + log1p(exp(-|x|)) (EUP exp/log).
    return jnp.maximum(x, 0.0) + jnp.log1p(jnp.exp(-jnp.abs(x)))


def _pinn_kernel(x_ref, p_ref, o_ref, *, chunk):
    """Fused MLP forward for one batch tile, feature-major layout.

    x_ref: [8, tile]          rows 0..4 features, row 5 = 1.0 (bias), rows 6..7 = 0
    p_ref: [PACK_ROWS, 128]   packed, padded [W | b | 0] blocks for every layer
    o_ref: [8, tile]          rows 0..5 outputs, rows 6..7 junk (sliced off outside)
    """
    tile = x_ref.shape[1]
    n_chunks = tile // chunk

    # Augmentation rows appended below each hidden activation: row 0 = ones
    # (multiplies the bias column of the next weight block), rows 1..7 = 0.
    aug = (lax.broadcasted_iota(jnp.int32, (8, chunk), 0) == 0).astype(jnp.float32)

    def body(ci, carry):
        base = pl.multiple_of(ci * chunk, chunk)
        xc = x_ref[:, pl.ds(base, chunk)].astype(jnp.float32)      # [8, chunk]

        # Layer 0: bias folded via the ones row already present in the input.
        h = jnp.dot(p_ref[0:HIDDEN, 0:IN0_PAD], xc,
                    preferred_element_type=jnp.float32, precision=HP)
        h = _gelu_exact(h)
        # TODO(synk): training-mode dropout (pltpu.prng_random_bits mask) not
        # implemented; forward is inference-mode (identity), like eval().

        for l in range(1, NUM_LAYERS):
            r0 = l * HIDDEN
            h_aug = jnp.concatenate([h, aug], axis=0)              # [40, chunk]
            h = jnp.dot(p_ref[r0:r0 + HIDDEN, 0:HID_AUG], h_aug,
                        preferred_element_type=jnp.float32, precision=HP)
            h = _gelu_exact(h)

        r0 = NUM_LAYERS * HIDDEN
        h_aug = jnp.concatenate([h, aug], axis=0)                  # [40, chunk]
        y = jnp.dot(p_ref[r0:r0 + OUT_PAD, 0:HID_AUG], h_aug,
                    preferred_element_type=jnp.float32, precision=HP)
        o_ref[:, pl.ds(base, chunk)] = _softplus(y).astype(o_ref.dtype)
        return carry

    lax.fori_loop(0, n_chunks, body, 0, unroll=True)


def _pack_params(params):
    """Pack [w0,b0,...,w_out,b_out] (w: [in,out], b: [1,out]) into one padded
    [PACK_ROWS, 128] f32 buffer of transposed weights with the bias folded in
    as an extra contraction column (col INPUT_DIM for layer 0, col HIDDEN for
    the rest)."""
    blocks = []
    # Layer 0: [HIDDEN, 128]; cols 0..4 = W0^T, col 5 = b0, rest 0.
    w0, b0 = params[0], params[1]
    blk = jnp.zeros((HIDDEN, PACK_COLS), jnp.float32)
    blk = blk.at[:, :INPUT_DIM].set(w0.T.astype(jnp.float32))
    blk = blk.at[:, INPUT_DIM].set(b0.reshape(-1).astype(jnp.float32))
    blocks.append(blk)
    # Hidden layers: [HIDDEN, 128]; cols 0..31 = W^T, col 32 = b, rest 0.
    for l in range(1, NUM_LAYERS):
        w, b = params[2 * l], params[2 * l + 1]
        blk = jnp.zeros((HIDDEN, PACK_COLS), jnp.float32)
        blk = blk.at[:, :HIDDEN].set(w.T.astype(jnp.float32))
        blk = blk.at[:, HIDDEN].set(b.reshape(-1).astype(jnp.float32))
        blocks.append(blk)
    # Output layer: [OUT_PAD, 128]; rows 0..5 used, rows 6..7 zero.
    w, b = params[2 * NUM_LAYERS], params[2 * NUM_LAYERS + 1]
    blk = jnp.zeros((OUT_PAD, PACK_COLS), jnp.float32)
    blk = blk.at[:OUTPUT_DIM, :HIDDEN].set(w.T.astype(jnp.float32))
    blk = blk.at[:OUTPUT_DIM, HIDDEN].set(b.reshape(-1).astype(jnp.float32))
    blocks.append(blk)
    return jnp.concatenate(blocks, axis=0)                         # [104, 128]


@partial(jax.jit, static_argnames=("tile_n", "chunk"))
def pinn_forward(x, params, *, tile_n=2048, chunk=512):
    """x: [N, INPUT_DIM] float32. params: flat list [w0,b0,...,w_out,b_out].

    Returns [N, OUTPUT_DIM] float32.
    """
    n, in_dim = x.shape
    assert in_dim == INPUT_DIM
    assert chunk % 128 == 0

    # --- tile selection: equal-sized, chunk-aligned, lane-dense tiles ---------
    n128 = _round_up(n, 128)
    if n128 <= chunk:
        tile = n128
        c = tile                          # single register-resident chunk
    else:
        cap = max(chunk, _round_up(tile_n, chunk))
        guess = pl.cdiv(n128, cap)
        tile = _round_up(pl.cdiv(n128, guess), chunk)
        c = chunk
    num_tiles = pl.cdiv(n128, tile)
    n_pad = num_tiles * tile

    # --- feature-major, 8-sublane-padded input with a ones row (bias) --------
    xt = jnp.concatenate(
        [x.T.astype(jnp.float32),                       # rows 0..4: features
         jnp.ones((1, n), jnp.float32),                 # row 5: bias input
         jnp.zeros((IN0_PAD - INPUT_DIM - 1, n), jnp.float32)],  # rows 6..7
        axis=0)
    if n_pad != n:
        xt = jnp.pad(xt, ((0, 0), (0, n_pad - n)))

    packed = _pack_params(params)                        # [PACK_ROWS, 128]

    # --- advisory cost estimate (helps XLA schedule around the custom call) --
    flops = 2 * n_pad * (HIDDEN * IN0_PAD
                         + (NUM_LAYERS - 1) * HIDDEN * HID_AUG
                         + OUT_PAD * HID_AUG)
    transcendentals = n_pad * (NUM_LAYERS * HIDDEN + 2 * OUT_PAD)
    bytes_accessed = 4 * (2 * IN0_PAD * n_pad + PACK_ROWS * PACK_COLS)

    out_t = pl.pallas_call(
        partial(_pinn_kernel, chunk=c),
        out_shape=jax.ShapeDtypeStruct((OUT_PAD, n_pad), jnp.float32),
        grid_spec=pltpu.PrefetchScalarGridSpec(
            num_scalar_prefetch=0,
            grid=(num_tiles,),
            in_specs=[
                pl.BlockSpec((IN0_PAD, tile), lambda i: (0, i)),
                # constant block index -> params DMA'd once, not per step
                pl.BlockSpec((PACK_ROWS, PACK_COLS), lambda i: (0, 0)),
            ],
            out_specs=pl.BlockSpec((OUT_PAD, tile), lambda i: (0, i)),
        ),
        compiler_params=pltpu.CompilerParams(
            dimension_semantics=("parallel",),
        ),
        cost_estimate=pl.CostEstimate(
            flops=flops,
            transcendentals=transcendentals,
            bytes_accessed=bytes_accessed,
        ),
    )(xt, packed)

    # Rows 6..7 and padded batch columns are junk by construction; slice off.
    return out_t[:OUTPUT_DIM, :n].T                      # [N, OUTPUT_DIM]


def init_params(key):
    """Deterministic init mimicking nn.Linear default (U[-1/sqrt(fan_in), ...])."""
    dims = [INPUT_DIM] + [HIDDEN] * NUM_LAYERS + [OUTPUT_DIM]
    params = []
    for i in range(len(dims) - 1):
        fan_in, fan_out = dims[i], dims[i + 1]
        key, kw, kb = jax.random.split(key, 3)
        bound = 1.0 / jnp.sqrt(jnp.float32(fan_in))
        w = jax.random.uniform(kw, (fan_in, fan_out), jnp.float32, -bound, bound)
        b = jax.random.uniform(kb, (1, fan_out), jnp.float32, -bound, bound)
        params += [w, b]
    return params


def pinn_reference(x, params):
    """Pure-JAX reference (exact erf GELU, stable softplus) for correctness."""
    h = x.astype(jnp.float32)
    for layer in range(NUM_LAYERS):
        w, b = params[2 * layer], params[2 * layer + 1]
        h = jax.nn.gelu(jnp.dot(h, w, precision=HP) + b, approximate=False)
    w_out, b_out = params[2 * NUM_LAYERS], params[2 * NUM_LAYERS + 1]
    return jax.nn.softplus(jnp.dot(h, w_out, precision=HP) + b_out)


if __name__ == "__main__":
    key = jax.random.PRNGKey(0)
    key, kx1, kx2, kx3 = jax.random.split(key, 4)
    params = init_params(key)

    # Small batch of collocation points (single tile, single chunk).
    N1 = 256
    x1 = jax.random.normal(kx1, (N1, INPUT_DIM), jnp.float32)
    out1 = jax.block_until_ready(pinn_forward(x1, params))
    ref1 = pinn_reference(x1, params)
    assert out1.shape == (N1, OUTPUT_DIM)
    assert jnp.allclose(out1, ref1, atol=1e-4, rtol=1e-4), "mismatch (N=256)"

    # Non-multiple-of-128 batch; exercises the padding / slice-back path.
    N2 = 100
    x2 = jax.random.normal(kx2, (N2, INPUT_DIM), jnp.float32)
    out2 = jax.block_until_ready(pinn_forward(x2, params))
    ref2 = pinn_reference(x2, params)
    assert out2.shape == (N2, OUTPUT_DIM)
    assert jnp.allclose(out2, ref2, atol=1e-4, rtol=1e-4), "mismatch (N=100)"

    # Larger batch; exercises the multi-chunk register-resident inner loop.
    N3 = 1536
    x3 = jax.random.normal(kx3, (N3, INPUT_DIM), jnp.float32)
    out3 = jax.block_until_ready(pinn_forward(x3, params))
    ref3 = pinn_reference(x3, params)
    assert out3.shape == (N3, OUTPUT_DIM)
    assert jnp.allclose(out3, ref3, atol=1e-4, rtol=1e-4), "mismatch (N=1536)"

    print("KERNEL_OK")
</pallas_src>

<mosaic_0001>
module attributes {stable_mosaic.version = 11 : i64} {
  func.func @_pinn_kernel(%arg0: i32, %arg1: memref<8x256xf32, #tpu.memory_space<vmem>>, %arg2: memref<104x128xf32, #tpu.memory_space<vmem>>, %arg3: memref<8x256xf32, #tpu.memory_space<vmem>>) attributes {dimension_semantics = [#tpu.dimension_semantics<parallel>], iteration_bounds = array<i64: 1>, scalar_prefetch = 0 : i64, scratch_operands = 0 : i64, tpu.core_type = #tpu.core_type<tc>, window_params = [{transform_indices = @transform_0, window_bounds = array<i64: 8, 256>}, {pipeline_mode = #tpu.pipeline_mode<synchronous>, transform_indices = @transform_1, window_bounds = array<i64: 104, 128>}, {transform_indices = @transform_2, window_bounds = array<i64: 8, 256>}]} {
    %0 = tpu.iota {dimensions = array<i32: 0>} : vector<8x256xi32>
    %c0_i32 = arith.constant 0 : i32
    %1 = vector.broadcast %c0_i32 : i32 to vector<8x256xi32>
    %2 = arith.cmpi eq, %0, %1 : vector<8x256xi32>
    %3 = arith.extui %2 : vector<8x256xi1> to vector<8x256xi32>
    %4 = arith.sitofp %3 : vector<8x256xi32> to vector<8x256xf32>
    %c0_i32_0 = arith.constant 0 : i32
    %c256_i32 = arith.constant 256 : i32
    %5 = arith.muli %c0_i32_0, %c256_i32 : i32
    %6 = tpu.assume_multiple %5, 256 : i32
    %c0 = arith.constant 0 : index
    %7 = arith.index_cast %6 : i32 to index
    %8 = vector.load %arg1[%c0, %7] : memref<8x256xf32, #tpu.memory_space<vmem>>, vector<8x256xf32>
    %c0_1 = arith.constant 0 : index
    %c0_2 = arith.constant 0 : index
    %9 = vector.load %arg2[%c0_1, %c0_2] : memref<104x128xf32, #tpu.memory_space<vmem>>, vector<32x8xf32>
    %cst = arith.constant dense<0.000000e+00> : vector<32x256xf32>
    %10 = tpu.matmul %9, %8, %cst {dimension_numbers = #tpu.dot_dimension_numbers<[1], [0], [0], [1], [0, 0, 1, 1], [], []>, precision = #tpu.contract_precision<fp32>} : vector<32x8xf32>, vector<8x256xf32>, vector<32x256xf32> -> vector<32x256xf32>
    %cst_3 = arith.constant 5.000000e-01 : f32
    %11 = vector.broadcast %cst_3 : f32 to vector<32x256xf32>
    %12 = arith.mulf %11, %10 : vector<32x256xf32>
    %cst_4 = arith.constant 0.707106769 : f32
    %13 = vector.broadcast %cst_4 : f32 to vector<32x256xf32>
    %14 = arith.mulf %10, %13 : vector<32x256xf32>
    %15 = math.erf %14 : vector<32x256xf32>
    %cst_5 = arith.constant 1.000000e+00 : f32
    %16 = vector.broadcast %cst_5 : f32 to vector<32x256xf32>
    %17 = arith.addf %16, %15 : vector<32x256xf32>
    %18 = arith.mulf %12, %17 : vector<32x256xf32>
    %19 = tpu.concatenate %18, %4 in 0 : vector<32x256xf32>, vector<8x256xf32> -> vector<40x256xf32>
    %c32 = arith.constant 32 : index
    %c0_6 = arith.constant 0 : index
    %20 = vector.load %arg2[%c32, %c0_6] : memref<104x128xf32, #tpu.memory_space<vmem>>, vector<32x40xf32>
    %cst_7 = arith.constant dense<0.000000e+00> : vector<32x256xf32>
    %21 = tpu.matmul %20, %19, %cst_7 {dimension_numbers = #tpu.dot_dimension_numbers<[1], [0], [0], [1], [0, 0, 1, 1], [], []>, precision = #tpu.contract_precision<fp32>} : vector<32x40xf32>, vector<40x256xf32>, vector<32x256xf32> -> vector<32x256xf32>
    %cst_8 = arith.constant 5.000000e-01 : f32
    %22 = vector.broadcast %cst_8 : f32 to vector<32x256xf32>
    %23 = arith.mulf %22, %21 : vector<32x256xf32>
    %cst_9 = arith.constant 0.707106769 : f32
    %24 = vector.broadcast %cst_9 : f32 to vector<32x256xf32>
    %25 = arith.mulf %21, %24 : vector<32x256xf32>
    %26 = math.erf %25 : vector<32x256xf32>
    %cst_10 = arith.constant 1.000000e+00 : f32
    %27 = vector.broadcast %cst_10 : f32 to vector<32x256xf32>
    %28 = arith.addf %27, %26 : vector<32x256xf32>
    %29 = arith.mulf %23, %28 : vector<32x256xf32>
    %30 = tpu.concatenate %29, %4 in 0 : vector<32x256xf32>, vector<8x256xf32> -> vector<40x256xf32>
    %c64 = arith.constant 64 : index
    %c0_11 = arith.constant 0 : index
    %31 = vector.load %arg2[%c64, %c0_11] : memref<104x128xf32, #tpu.memory_space<vmem>>, vector<32x40xf32>
    %cst_12 = arith.constant dense<0.000000e+00> : vector<32x256xf32>
    %32 = tpu.matmul %31, %30, %cst_12 {dimension_numbers = #tpu.dot_dimension_numbers<[1], [0], [0], [1], [0, 0, 1, 1], [], []>, precision = #tpu.contract_precision<fp32>} : vector<32x40xf32>, vector<40x256xf32>, vector<32x256xf32> -> vector<32x256xf32>
    %cst_13 = arith.constant 5.000000e-01 : f32
    %33 = vector.broadcast %cst_13 : f32 to vector<32x256xf32>
    %34 = arith.mulf %33, %32 : vector<32x256xf32>
    %cst_14 = arith.constant 0.707106769 : f32
    %35 = vector.broadcast %cst_14 : f32 to vector<32x256xf32>
    %36 = arith.mulf %32, %35 : vector<32x256xf32>
    %37 = math.erf %36 : vector<32x256xf32>
    %cst_15 = arith.constant 1.000000e+00 : f32
    %38 = vector.broadcast %cst_15 : f32 to vector<32x256xf32>
    %39 = arith.addf %38, %37 : vector<32x256xf32>
    %40 = arith.mulf %34, %39 : vector<32x256xf32>
    %41 = tpu.concatenate %40, %4 in 0 : vector<32x256xf32>, vector<8x256xf32> -> vector<40x256xf32>
    %c96 = arith.constant 96 : index
    %c0_16 = arith.constant 0 : index
    %42 = vector.load %arg2[%c96, %c0_16] : memref<104x128xf32, #tpu.memory_space<vmem>>, vector<8x40xf32>
    %cst_17 = arith.constant dense<0.000000e+00> : vector<8x256xf32>
    %43 = tpu.matmul %42, %41, %cst_17 {dimension_numbers = #tpu.dot_dimension_numbers<[1], [0], [0], [1], [0, 0, 1, 1], [], []>, precision = #tpu.contract_precision<fp32>} : vector<8x40xf32>, vector<40x256xf32>, vector<8x256xf32> -> vector<8x256xf32>
    %cst_18 = arith.constant 0.000000e+00 : f32
    %44 = vector.broadcast %cst_18 : f32 to vector<8x256xf32>
    %45 = arith.maximumf %43, %44 : vector<8x256xf32>
    %46 = math.absf %43 : vector<8x256xf32>
    %cst_19 = arith.constant 0.000000e+00 : f32
    %47 = vector.broadcast %cst_19 : f32 to vector<8x256xf32>
    %48 = arith.subf %47, %46 : vector<8x256xf32>
    %49 = math.exp %48 : vector<8x256xf32>
    %50 = math.log1p %49 : vector<8x256xf32>
    %51 = arith.addf %45, %50 : vector<8x256xf32>
    %c0_20 = arith.constant 0 : index
    %52 = arith.index_cast %6 : i32 to index
    %53 = vector.load %arg3[%c0_20, %52] : memref<8x256xf32, #tpu.memory_space<vmem>>, vector<8x256xf32>
    tpu.vector_store %arg3[%c0_20, %52], %51 {strides = array<i32>} : memref<8x256xf32, #tpu.memory_space<vmem>>, vector<8x256xf32>,
    %c1_i32 = arith.constant 1 : i32
    return
  }
  func.func @transform_0(%arg0: i32) -> (i32, i32) {
    %c0_i32 = arith.constant 0 : i32
    %c0_i32_0 = arith.constant 0 : i32
    return %c0_i32, %arg0 : i32, i32
  }
  func.func @transform_1(%arg0: i32) -> (i32, i32) {
    %c0_i32 = arith.constant 0 : i32
    %c0_i32_0 = arith.constant 0 : i32
    %c0_i32_1 = arith.constant 0 : i32
    return %c0_i32, %c0_i32_0 : i32, i32
  }
  func.func @transform_2(%arg0: i32) -> (i32, i32) {
    %c0_i32 = arith.constant 0 : i32
    %c0_i32_0 = arith.constant 0 : i32
    return %c0_i32, %arg0 : i32, i32
  }
}

</mosaic_0001>

<bundles_post_ra>
// kernel: pinn_forward.1
= control target key start
LH: loop header
LB: loop body
LE: loop exit
PB: predicated region body
PF: predicated region fallthrough
CT: control target
= control target key end

     0   :  { %vm22_vm0 = vcmask 64512   ;;  %v3192_v2 = vmov 0.0   ;;  %vm691_vm1 = vcmask 326656   ;;  %s3787_s0 = inlined_call_operand.vmem [shape: f32[8,256], index: 0, kind: input, shape index: {}]   ;;  %s3788_s1 = inlined_call_operand.vmem [shape: f32[104,128], index: 1, kind: input, shape index: {}]   ;;  %s3789_s2 = inlined_call_operand.vmem [shape: f32[8,256], index: 2, kind: output, shape index: {}]  }
   0x1   :  { %v17_v0 = vld [vmem:[%s3787_s0 + $0x8] sm:$0xff]  ;;  %v16_v1 = vld [vmem:[%s3787_s0] sm:$0xff]  ;;  %220 = vmatprep.mubr.f32.mxu0 %v3192_v2  ;;  %101 = vmatprep.mubr.f32.mxu1 %v3192_v2  ;;  %v20_v8 = vld [vmem:[%s3788_s1 + $0x10] sm:$0xff] }
   0x2   :  { %v18_v3 = vld [vmem:[%s3788_s1] sm:$0xff]  ;;  %v3220_v4 = vand.u32 4294901760, %v17_v0  ;;  %v3222_v5 = vand.u32 4294901760, %v16_v1  ;;  %v19_v7 = vld [vmem:[%s3788_s1 + $0x8] sm:$0xff]  ;;  %v30_v14 = vsel %vm22_vm0, %v20_v8, 0  ;;  %v21_v16 = vld [vmem:[%s3788_s1 + $0x18] sm:$0xff] }
   0x3   :  { %v24_v6 = vsel %vm22_vm0, %v18_v3, 0  ;;  %v27_v10 = vsel %vm22_vm0, %v19_v7, 0  ;;  %v3249_v20 = vand.u32 4294901760, %v30_v14  ;;  %v33_v24 = vsel %vm22_vm0, %v21_v16, 0  ;;  %v687_v52 = vld [vmem:[%s3788_s1 + $0x20] sm:$0xff]  ;;  %v688_v60 = vld [vmem:[%s3788_s1 + $0x28] sm:$0xff] }
   0x4   :  { %v3231_v9 = vand.u32 4294901760, %v24_v6  ;;  %v147_v11 = vsub.f32 %v17_v0, %v3220_v4  ;;  %v3236_v12 = vsub.f32 %v16_v1, %v3222_v5  ;;  %v3238_v13 = vand.u32 4294901760, %v27_v10  ;;  %36 = vmatprep.subr.mxu1 %v3220_v4 }
   0x5   :  { %38 = vmatpush1.msra.mxu1 %v3222_v5  ;;  %v125_v26 = vsub.f32 %v30_v14, %v3249_v20  ;;  %v3254_v31 = vand.u32 4294901760, %v33_v24  ;;  %v693_v57 = vsel %vm691_vm1, %v687_v52, 0  ;;  %v11_v3 = vlaneseq }
   0x6   :  { %v103_v15 = vsub.f32 %v24_v6, %v3231_v9  ;;  %v148_v17 = vand.u32 4294901760, %v147_v11  ;;  %v154_v18 = vand.u32 4294901760, %v3236_v12  ;;  %v114_v19 = vsub.f32 %v27_v10, %v3238_v13 }
   0x7   :  { %v126_v32 = vand.u32 4294901760, %v125_v26  ;;  %v136_v34 = vsub.f32 %v33_v24, %v3254_v31  ;;  %v3305_v63 = vand.u32 4294901760, %v693_v57 }
   0x8   :  { %v104_v21 = vand.u32 4294901760, %v103_v15  ;;  %v149_v22 = vsub.f32 %v147_v11, %v148_v17  ;;  %v155_v23 = vsub.f32 %v3236_v12, %v154_v18  ;;  %v115_v25 = vand.u32 4294901760, %v114_v19 }
   0x9   :  { %v127_v36 = vsub.f32 %v125_v26, %v126_v32  ;;  %v137_v37 = vand.u32 4294901760, %v136_v34 }
   0xa   :  { %v105_v27 = vsub.f32 %v103_v15, %v104_v21  ;;  %v150_v28 = vand.u32 4294901760, %v149_v22  ;;  %v156_v29 = vand.u32 4294901760, %v155_v23  ;;  %v116_v30 = vsub.f32 %v114_v19, %v115_v25 }
   0xb   :  { %v128_v38 = vand.u32 4294901760, %v127_v36  ;;  %v138_v39 = vsub.f32 %v136_v34, %v137_v37 }
   0xc   :  { %v106_v33 = vand.u32 4294901760, %v105_v27  ;;  %151 = vmatprep.subr.mxu0 %v150_v28  ;;  %v117_v35 = vand.u32 4294901760, %v116_v30 }
   0xd   :  { %157 = vmatpush1.msra.mxu0 %v156_v29  ;;  %v139_v40 = vand.u32 4294901760, %v138_v39 }
   0xe   :  { %107 = vmatmul.mubr.f32.vlgmr.msra.gmra.mrb[0].mxu1 %v106_v33  ;;  %222 = vmatmul.mubr.f32.vlgmr.msra.gmra.mrb[0].mxu0 %v3231_v9 }
   0xf   :  { %251 = vmatprep.subr.mxu0 %v147_v11  ;;  %227 = vmatprep.mubr.f32.mxu0 %v3192_v2 }
  0x10   :  { %254 = vmatpush1.msra.mxu0 %v3236_v12  ;;  %112 = vmatprep.mubr.f32.mxu1 %v3192_v2 }
  0x11   :  { %351 = vmatprep.subr.mxu0 %v3220_v4 }
  0x12   :  { %118 = vmatmul.mubr.f32.gmra.mrb[2].mxu1 %v117_v35  ;;  %229 = vmatmul.mubr.f32.gmra.mrb[2].mxu0 %v3238_v13 }
  0x13   :  { %123 = vmatprep.mubr.f32.mxu1 %v3192_v2  ;;  %234 = vmatprep.mubr.f32.mxu0 %v3192_v2 }
  0x16   :  { %129 = vmatmul.mubr.f32.gmra.mrb[4].mxu1 %v128_v38  ;;  %236 = vmatmul.mubr.f32.gmra.mrb[4].mxu0 %v3249_v20 }
  0x17   :  { %134 = vmatprep.mubr.f32.mxu1 %v3192_v2  ;;  %241 = vmatprep.mubr.f32.mxu0 %v3192_v2 }
  0x1a   :  { %140 = vmatmul.mubr.f32.gmra.mrb[6].mxu1 %v139_v40  ;;  %243 = vmatmul.mubr.f32.gmra.mrb[6].mxu0 %v3254_v31 }
  0x1b   :  { %778 = vmatprep.mubr.f32.mxu1 %v3192_v2  ;;  %317 = vmatprep.mubr.f32.mxu0 %v3192_v2 }
  0x1e   :  { %320 = vmatmul.mubr.f32.vlgmr.msra.gmra.mrb[0].mxu0 %v103_v15 }
  0x1f   :  { %325 = vmatprep.mubr.f32.mxu0 %v3192_v2  ;;  %353 = vmatpush1.msra.mxu0 %v3222_v5 }
  0x20   :  { %456 = vmatprep.subr.mxu0 %v148_v17 }
  0x22   :  { %328 = vmatmul.mubr.f32.gmra.mrb[2].mxu0 %v114_v19 }
  0x23   :  { %333 = vmatprep.mubr.f32.mxu0 %v3192_v2 }
  0x26   :  { %336 = vmatmul.mubr.f32.gmra.mrb[4].mxu0 %v125_v26 }
  0x27   :  { %341 = vmatprep.mubr.f32.mxu0 %v3192_v2 }
  0x2a   :  { %344 = vmatmul.mubr.f32.gmra.mrb[6].mxu0 %v136_v34  ;;  %v690_v34 = vld [vmem:[%s3788_s1 + $0x38] sm:$0xff] }
  0x2b   :  { %416 = vmatprep.mubr.f32.mxu0 %v3192_v2 }
  0x2e   :  { %420 = vmatmul.mubr.f32.vlgmr.msra.gmra.mrb[0].mxu0 %v104_v21  ;;  %v689_v21 = vld [vmem:[%s3788_s1 + $0x30] sm:$0xff] }
  0x2f   :  { %425 = vmatprep.mubr.f32.mxu0 %v3192_v2  ;;  %460 = vmatpush1.msra.mxu0 %v154_v18  ;;  %v3324_v29 = vsel %vm691_vm1, %v689_v21, 0 }
  0x30   :  { %553 = vmatprep.subr.mxu0 %v3220_v4  ;;  %v696_v4 = vsel %vm691_vm1, %v688_v60, 0 }
  0x31   :  { %v3311_v10 = vand.u32 4294901760, %v696_v4 }
  0x32   :  { %429 = vmatmul.mubr.f32.gmra.mrb[2].mxu0 %v115_v25 }
  0x33   :  { %434 = vmatprep.mubr.f32.mxu0 %v3192_v2 }
  0x36   :  { %438 = vmatmul.mubr.f32.gmra.mrb[4].mxu0 %v126_v32 }
  0x37   :  { %443 = vmatprep.mubr.f32.mxu0 %v3192_v2 }
  0x3a   :  { %447 = vmatmul.mubr.f32.gmra.mrb[6].mxu0 %v137_v37 }
  0x3b   :  { %523 = vmatprep.mubr.f32.mxu0 %v3192_v2 }
  0x3e   :  { %525 = vmatmul.mubr.f32.vlgmr.msra.gmra.mrb[0].mxu0 %v3231_v9 }
  0x3f   :  { %530 = vmatprep.mubr.f32.mxu0 %v3192_v2  ;;  %555 = vmatpush1.msra.mxu0 %v3222_v5 }
  0x42   :  { %532 = vmatmul.mubr.f32.gmra.mrb[2].mxu0 %v3238_v13 }
  0x43   :  { %537 = vmatprep.mubr.f32.mxu0 %v3192_v2 }
  0x46   :  { %539 = vmatmul.mubr.f32.gmra.mrb[4].mxu0 %v3249_v20 }
  0x47   :  { %544 = vmatprep.mubr.f32.mxu0 %v3192_v2 }
  0x4a   :  { %546 = vmatmul.mubr.f32.gmra.mrb[6].mxu0 %v3254_v31 }
  0x4b   :  { %618 = vmatprep.mubr.f32.mxu0 %v3192_v2 }
  0x4e   :  { %620 = vmatmul.mubr.f32.vlgmr.msra.gmra.mrb[0].mxu0 %v3231_v9  ;;  %v3309_v9 = vsub.f32 %v693_v57, %v3305_v63 }
  0x4f   :  { %625 = vmatprep.mubr.f32.mxu0 %v3192_v2 }
  0x50   :  { %v781_v19 = vand.u32 4294901760, %v3309_v9 }
  0x52   :  { %627 = vmatmul.mubr.f32.gmra.mrb[2].mxu0 %v3238_v13  ;;  %v3313_v13 = vshrl.u32 %v11_v3, 7  ;;  %v3329_v32 = vsub.f32 %v3309_v9, %v781_v19 }
  0x53   :  { %632 = vmatprep.mubr.f32.mxu0 %v3192_v2 }
  0x54   :  { %vm13_vm2 = vcmp.eq.s32.totalorder %v3313_v13, 0 }
  0x55   :  { %v2841_v33 = vsel %vm13_vm2, 1.0, %v3192_v2 }
  0x56   :  { %634 = vmatmul.mubr.f32.gmra.mrb[4].mxu0 %v3249_v20  ;;  %v3317_v20 = vsub.f32 %v696_v4, %v3311_v10 }
  0x57   :  { %639 = vmatprep.mubr.f32.mxu0 %v3192_v2 }
  0x58   :  { %v792_v39 = vand.u32 4294901760, %v3317_v20 }
  0x5a   :  { %641 = vmatmul.mubr.f32.gmra.mrb[6].mxu0 %v3254_v31 }
  0x5b   :  { %1550 = vmatprep.mubr.f32.mxu0 %v3192_v2 }
  0xe1   :  { %v108_v41 = vpop.f32.mrb[0].mxu1 }
  0xe2   :  { %v110_v42 = vpop.f32.mrb[1].mxu1 }
  0xe5   :  { %v119_v43 = vpop.f32.mrb[2].mxu1 }
  0xe6   :  { %v121_v44 = vpop.f32.mrb[3].mxu1 }
  0xe9   :  { %v130_v45 = vpop.f32.mrb[4].mxu1 }
  0xea   :  { %v132_v46 = vpop.f32.mrb[5].mxu1 }
  0xed   :  { %v141_v47 = vpop.f32.mrb[6].mxu1 }
  0xee   :  { %v143_v48 = vpop.f32.mrb[7].mxu1 }
 0x121   :  { %v621_v49 = vpop.f32.mrb[0].mxu0 }
 0x122   :  { %v3004_v50 = vadd.f32 %v621_v49, %v108_v41  ;;  %v623_v51 = vpop.f32.mrb[1].mxu0 }
 0x123   :  { %v3005_v53 = vadd.f32 %v623_v51, %v110_v42 }
 0x124   :  { %v655_v54 = vmul.f32 0.70710677, %v3004_v50  ;;  %v647_v23 = vmul.f32 0.5, %v3004_v50 }
 0x125   :  { %v656_v55 = vmul.f32 0.70710677, %v3005_v53  ;;  %v628_v56 = vpop.f32.mrb[2].mxu0  ;;  %v648_v26 = vmul.f32 0.5, %v3005_v53 }
 0x126   :  { %3136 = verf.f32 %v655_v54  ;;  %v3006_v58 = vadd.f32 %v628_v56, %v119_v43  ;;  %v630_v59 = vpop.f32.mrb[3].mxu0  ;;  %v3339_v43 = vand.u32 4294901760, %v3324_v29 }
 0x127   :  { %3138 = verf.f32 %v656_v55  ;;  %v3007_v61 = vadd.f32 %v630_v59, %v121_v44 }
 0x128   :  { %v657_v62 = vmul.f32 0.70710677, %v3006_v58  ;;  %v649_v37 = vmul.f32 0.5, %v3006_v58 }
 0x129   :  { %v658_v0 = vmul.f32 0.70710677, %v3007_v61  ;;  %v635_v1 = vpop.f32.mrb[4].mxu0  ;;  %v650_v40 = vmul.f32 0.5, %v3007_v61 }
 0x12a   :  { %3140 = verf.f32 %v657_v62  ;;  %v3008_v5 = vadd.f32 %v635_v1, %v130_v45  ;;  %v637_v6 = vpop.f32.mrb[5].mxu0 }
 0x12b   :  { %3142 = verf.f32 %v658_v0  ;;  %v3009_v7 = vadd.f32 %v637_v6, %v132_v46  ;;  %v3343_v46 = vsub.f32 %v2841_v33, %v2841_v33 }
 0x12c   :  { %v659_v8 = vmul.f32 0.70710677, %v3008_v5  ;;  %v651_v50 = vmul.f32 0.5, %v3008_v5 }
 0x12d   :  { %v660_v11 = vmul.f32 0.70710677, %v3009_v7  ;;  %v642_v12 = vpop.f32.mrb[6].mxu0  ;;  %v652_v51 = vmul.f32 0.5, %v3009_v7 }
 0x12e   :  { %3144 = verf.f32 %v659_v8  ;;  %v3010_v14 = vadd.f32 %v642_v12, %v141_v47  ;;  %v644_v15 = vpop.f32.mrb[7].mxu0  ;;  %v3346_v47 = vsel %vm691_vm1, %v690_v34, 0 }
 0x12f   :  { %3146 = verf.f32 %v660_v11  ;;  %v3011_v16 = vadd.f32 %v644_v15, %v143_v48 }
 0x130   :  { %v3137_v17 = vpop.eup %3136  ;;  %v661_v18 = vmul.f32 0.70710677, %v3010_v14  ;;  %v653_v57 = vmul.f32 0.5, %v3010_v14 }
 0x131   :  { %v3139_v22 = vpop.eup %3138  ;;  %v671_v24 = vadd.f32 1.0, %v3137_v17  ;;  %v662_v25 = vmul.f32 0.70710677, %v3011_v16  ;;  %v654_v59 = vmul.f32 0.5, %v3011_v16 }
 0x132   :  { %v672_v27 = vadd.f32 1.0, %v3139_v22  ;;  %3148 = verf.f32 %v661_v18 }
 0x133   :  { %v679_v28 = vmul.f32 %v671_v24, %v647_v23  ;;  %3150 = verf.f32 %v662_v25 }
 0x134   :  { %v3141_v30 = vpop.eup %3140  ;;  %v680_v31 = vmul.f32 %v672_v27, %v648_v26 }
 0x135   :  { %v3143_v35 = vpop.eup %3142  ;;  %v706_v36 = vand.u32 4294901760, %v679_v28  ;;  %v673_v38 = vadd.f32 1.0, %v3141_v30 }
 0x136   :  { %v674_v41 = vadd.f32 1.0, %v3143_v35  ;;  %v704_v42 = vand.u32 4294901760, %v680_v31 }
 0x137   :  { %v3341_v44 = vsub.f32 %v679_v28, %v706_v36  ;;  %v681_v45 = vmul.f32 %v673_v38, %v649_v37 }
 0x138   :  { %v3145_v48 = vpop.eup %3144  ;;  %v682_v49 = vmul.f32 %v674_v41, %v650_v40  ;;  %v3348_v52 = vsub.f32 %v680_v31, %v704_v42 }
 0x139   :  { %v3147_v53 = vpop.eup %3146  ;;  %v831_v54 = vand.u32 4294901760, %v3341_v44  ;;  %v710_v55 = vand.u32 4294901760, %v681_v45  ;;  %v675_v56 = vadd.f32 1.0, %v3145_v48 }
 0x13a   :  { %v676_v58 = vadd.f32 1.0, %v3147_v53  ;;  %v708_v60 = vand.u32 4294901760, %v682_v49  ;;  %v825_v61 = vand.u32 4294901760, %v3348_v52 }
 0x13b   :  { %v3352_v62 = vsub.f32 %v681_v45, %v710_v55  ;;  %v683_v0 = vmul.f32 %v675_v56, %v651_v50  ;;  %v3354_v1 = vpack.c.bf16 %v710_v55, %v706_v36  ;;  %v832_v3 = vsub.f32 %v3341_v44, %v831_v54 }
 0x13c   :  { %v3149_v4 = vpop.eup %3148  ;;  %v684_v5 = vmul.f32 %v676_v58, %v652_v51  ;;  %v3357_v6 = vpack.c.bf16 %v708_v60, %v704_v42  ;;  %v3359_v7 = vsub.f32 %v682_v49, %v708_v60  ;;  %v826_v8 = vsub.f32 %v3348_v52, %v825_v61 }
 0x13d   :  { %v3151_v11 = vpop.eup %3150  ;;  %v843_v12 = vand.u32 4294901760, %v3352_v62  ;;  %v714_v14 = vand.u32 4294901760, %v683_v0  ;;  %v677_v15 = vadd.f32 1.0, %v3149_v4  ;;  %v833_v16 = vand.u32 4294901760, %v832_v3 }
 0x13e   :  { %v678_v17 = vadd.f32 1.0, %v3151_v11  ;;  %2861 = vmatprep.subr.bf16.mxu1 %v3357_v6  ;;  %v712_v18 = vand.u32 4294901760, %v684_v5  ;;  %v827_v21 = vand.u32 4294901760, %v826_v8  ;;  %v837_v22 = vand.u32 4294901760, %v3359_v7 }
 0x13f   :  { %v3365_v23 = vsub.f32 %v683_v0, %v714_v14  ;;  %v685_v24 = vmul.f32 %v677_v15, %v653_v57  ;;  %2863 = vmatpush1.bf16.msra.mxu1 %v3354_v1  ;;  %v844_v25 = vsub.f32 %v3352_v62, %v843_v12  ;;  %v2876_v26 = vpack.c.bf16 %v3359_v7, %v3348_v52 }
 0x140   :  { %v686_v27 = vmul.f32 %v678_v17, %v654_v59  ;;  %v3371_v28 = vsub.f32 %v684_v5, %v712_v18  ;;  %v838_v30 = vsub.f32 %v3359_v7, %v837_v22  ;;  %v2878_v31 = vpack.c.bf16 %v3352_v62, %v3341_v44  ;;  %v1461_v62 = vld [vmem:[%s3788_s1 + $0x48] sm:$0xff] }
 0x141   :  { %v855_v33 = vand.u32 4294901760, %v3365_v23  ;;  %v718_v34 = vand.u32 4294901760, %v685_v24  ;;  %v845_v35 = vand.u32 4294901760, %v844_v25  ;;  %v3377_v36 = vpack.c.bf16 %v837_v22, %v825_v61 }
 0x142   :  { %v716_v37 = vand.u32 4294901760, %v686_v27  ;;  %v839_v38 = vand.u32 4294901760, %v838_v30  ;;  %v849_v40 = vand.u32 4294901760, %v3371_v28  ;;  %v3380_v41 = vpack.c.bf16 %v843_v12, %v831_v54 }
 0x143   :  { %v866_v42 = vsub.f32 %v685_v24, %v718_v34  ;;  %v3382_v45 = vpack.c.bf16 %v718_v34, %v714_v14  ;;  %v2870_v48 = vpack.c.bf16 %v845_v35, %v833_v16  ;;  %v3386_v49 = vsub.f32 %v3324_v29, %v3339_v43 }
 0x144   :  { %v3388_v50 = vpack.c.bf16 %v716_v37, %v712_v18  ;;  %v860_v51 = vsub.f32 %v686_v27, %v716_v37  ;;  %v2868_v53 = vpack.c.bf16 %v839_v38, %v827_v21  ;;  %v3391_v55 = vand.u32 4294901760, %v3346_v47 }
 0x145   :  { %v867_v56 = vand.u32 4294901760, %v866_v42  ;;  %v856_v57 = vsub.f32 %v3365_v23, %v855_v33  ;;  %v2882_v54 = vpack.c.bf16 %v866_v42, %v3365_v23  ;;  %v850_v58 = vsub.f32 %v3371_v28, %v849_v40 }
 0x146   :  { %2865 = vmatprep.subr.bf16.mxu1 %v3388_v50  ;;  %v861_v59 = vand.u32 4294901760, %v860_v51  ;;  %v3398_v29 = vand.u32 4294901760, %v3343_v46  ;;  %v2880_v60 = vpack.c.bf16 %v860_v51, %v3371_v28  ;;  %v783_v61 = vand.u32 4294901760, %v3329_v32 }
 0x147   :  { %2867 = vmatpush1.bf16.msra.mxu1 %v3382_v45  ;;  %v793_v0 = vsub.f32 %v3317_v20, %v792_v39  ;;  %v868_v3 = vsub.f32 %v866_v42, %v867_v56  ;;  %v3406_v4 = vpack.c.bf16 %v867_v56, %v855_v33  ;;  %v3193_v5 = vmov 1.0  }
 0x148   :  { %2842 = vmatprep.subr.msk.mxu1 %vm13_vm2, %v3193_v5  ;;  %v862_v8 = vsub.f32 %v860_v51, %v861_v59  ;;  %v803_v11 = vand.u32 4294901760, %v3386_v49  ;;  %v3414_v12 = vsub.f32 %v3346_v47, %v3391_v55  ;;  %v2896_v32 = vpack.c.bf16 %v861_v59, %v849_v40  ;;  %v1462_v51 = vld [vmem:[%s3788_s1 + $0x50] sm:$0xff] }
 0x149   :  { %v857_v14 = vand.u32 4294901760, %v856_v57  ;;  %v869_v15 = vand.u32 4294901760, %v868_v3  ;;  %v851_v16 = vand.u32 4294901760, %v850_v58  ;;  %v874_v18 = vsub.f32 %v3343_v46, %v3398_v29 }
 0x14a   :  { %v863_v17 = vand.u32 4294901760, %v862_v8  ;;  %v794_v23 = vand.u32 4294901760, %v793_v0  ;;  %v804_v47 = vsub.f32 %v3386_v49, %v803_v11  ;;  %v814_v24 = vand.u32 4294901760, %v3414_v12 }
 0x14b   :  { %2843 = vmatpush1.msk.msra.mxu1 %vm13_vm2, %v3193_v5  ;;  %v2874_v21 = vpack.c.bf16 %v869_v15, %v857_v14  ;;  %v3426_v25 = vand.u32 4294901760, %v874_v18  ;;  %v3532_v59 = vsel %vm691_vm1, %v1462_v51, 0 }
 0x14c   :  { %784 = vmatmul.mubr.f32.vlgmr.msra.gmra.mrb[8].mxu1 %v783_v61  ;;  %2869 = vmatprep.subr.bf16.mxu1 %v2868_v53  ;;  %v2872_v22 = vpack.c.bf16 %v863_v17, %v851_v16  ;;  %v805_v27 = vand.u32 4294901760, %v804_v47  ;;  %v815_v28 = vsub.f32 %v3414_v12, %v814_v24  ;;  %v3546_v17 = vand.u32 4294901760, %v3532_v59 }
 0x14d   :  { %2871 = vmatpush1.bf16.msra.mxu1 %v2870_v48  ;;  %789 = vmatprep.mubr.f32.mxu1 %v3192_v2 }
 0x14e   :  { %2873 = vmatprep.subr.bf16.mxu1 %v2872_v22  ;;  %v816_v30 = vand.u32 4294901760, %v815_v28 }
 0x150   :  { %795 = vmatmul.mubr.f32.gmra.mrb[10].mxu1 %v794_v23 }
 0x151   :  { %2875 = vmatpush1.bf16.msra.mxu1 %v2874_v21  ;;  %800 = vmatprep.mubr.f32.mxu1 %v3192_v2 }
 0x152   :  { %876 = vmatprep.subr.mxu1 %v3426_v25 }
 0x154   :  { %806 = vmatmul.mubr.f32.gmra.mrb[12].mxu1 %v805_v27 }
 0x155   :  { %882 = vmatpush1.msra.mxu1 %v3426_v25  ;;  %811 = vmatprep.mubr.f32.mxu1 %v3192_v2 }
 0x156   :  { %2877 = vmatprep.subr.bf16.mxu1 %v2876_v26  ;;  %v1468_v26 = vsel %vm691_vm1, %v1461_v62, 0 }
 0x158   :  { %817 = vmatmul.mubr.f32.gmra.mrb[14].mxu1 %v816_v30 }
 0x159   :  { %937 = vmatprep.mubr.f32.mxu1 %v3192_v2 }
 0x15c   :  { %939 = vmatmul.mubr.f32.vlgmr.msra.gmra.mrb[8].mxu1 %v3305_v63 }
 0x15d   :  { %2879 = vmatpush1.bf16.msra.mxu1 %v2878_v31  ;;  %944 = vmatprep.mubr.f32.mxu1 %v3192_v2 }
 0x15e   :  { %2881 = vmatprep.subr.bf16.mxu1 %v2880_v60  ;;  %v1463_v60 = vld [vmem:[%s3788_s1 + $0x58] sm:$0xff] }
 0x15f   :  { %v3549_v18 = vsel %vm691_vm1, %v1463_v60, 0 }
 0x160   :  { %946 = vmatmul.mubr.f32.gmra.mrb[10].mxu1 %v3311_v10 }
 0x161   :  { %2883 = vmatpush1.bf16.msra.mxu1 %v2882_v54  ;;  %951 = vmatprep.mubr.f32.mxu1 %v3192_v2 }
 0x162   :  { %992 = vmatprep.subr.mxu1 %v3343_v46 }
 0x164   :  { %953 = vmatmul.mubr.f32.gmra.mrb[12].mxu1 %v3339_v43 }
 0x165   :  { %995 = vmatpush1.msra.mxu1 %v3343_v46  ;;  %958 = vmatprep.mubr.f32.mxu1 %v3192_v2 }
 0x166   :  { %2885 = vmatprep.subr.bf16.mxu1 %v3357_v6 }
 0x168   :  { %960 = vmatmul.mubr.f32.gmra.mrb[14].mxu1 %v3391_v55 }
 0x169   :  { %1050 = vmatprep.mubr.f32.mxu1 %v3192_v2 }
 0x16c   :  { %1053 = vmatmul.mubr.f32.vlgmr.msra.gmra.mrb[8].mxu1 %v3309_v9 }
 0x16d   :  { %2887 = vmatpush1.bf16.msra.mxu1 %v3354_v1  ;;  %1058 = vmatprep.mubr.f32.mxu1 %v3192_v2 }
 0x16e   :  { %2889 = vmatprep.subr.bf16.mxu1 %v3388_v50 }
 0x170   :  { %1061 = vmatmul.mubr.f32.gmra.mrb[10].mxu1 %v3317_v20 }
 0x171   :  { %2891 = vmatpush1.bf16.msra.mxu1 %v3382_v45  ;;  %1066 = vmatprep.mubr.f32.mxu1 %v3192_v2 }
 0x172   :  { %2844 = vmatprep.subr.msk.mxu1 %vm13_vm2, %v3193_v5 }
 0x174   :  { %1069 = vmatmul.mubr.f32.gmra.mrb[12].mxu1 %v3386_v49 }
 0x175   :  { %2845 = vmatpush1.msk.msra.mxu1 %vm13_vm2, %v3193_v5  ;;  %1074 = vmatprep.mubr.f32.mxu1 %v3192_v2 }
 0x176   :  { %2893 = vmatprep.subr.bf16.mxu1 %v3377_v36  ;;  %v3522_v36 = vand.u32 4294901760, %v1468_v26 }
 0x178   :  { %1077 = vmatmul.mubr.f32.gmra.mrb[14].mxu1 %v3414_v12  ;;  %v3529_v56 = vsub.f32 %v1468_v26, %v3522_v36 }
 0x179   :  { %1157 = vmatprep.mubr.f32.mxu1 %v3192_v2 }
 0x17a   :  { %v1564_v14 = vand.u32 4294901760, %v3529_v56 }
 0x17c   :  { %1161 = vmatmul.mubr.f32.vlgmr.msra.gmra.mrb[8].mxu1 %v781_v19  ;;  %v1460_v19 = vld [vmem:[%s3788_s1 + $0x40] sm:$0xff] }
 0x17d   :  { %2895 = vmatpush1.bf16.msra.mxu1 %v3380_v41  ;;  %1166 = vmatprep.mubr.f32.mxu1 %v3192_v2 }
 0x17e   :  { %2897 = vmatprep.subr.bf16.mxu1 %v2896_v32 }
 0x180   :  { %1170 = vmatmul.mubr.f32.gmra.mrb[10].mxu1 %v792_v39 }
 0x181   :  { %2899 = vmatpush1.bf16.msra.mxu1 %v3406_v4  ;;  %1175 = vmatprep.mubr.f32.mxu1 %v3192_v2 }
 0x182   :  { %1229 = vmatprep.subr.mxu1 %v3398_v29 }
 0x184   :  { %1179 = vmatmul.mubr.f32.gmra.mrb[12].mxu1 %v803_v11 }
 0x185   :  { %1233 = vmatpush1.msra.mxu1 %v3398_v29  ;;  %1184 = vmatprep.mubr.f32.mxu1 %v3192_v2 }
 0x186   :  { %2901 = vmatprep.subr.bf16.mxu1 %v3357_v6 }
 0x188   :  { %1188 = vmatmul.mubr.f32.gmra.mrb[14].mxu1 %v814_v24 }
 0x189   :  { %1288 = vmatprep.mubr.f32.mxu1 %v3192_v2 }
 0x18c   :  { %1290 = vmatmul.mubr.f32.vlgmr.msra.gmra.mrb[8].mxu1 %v3305_v63 }
 0x18d   :  { %2903 = vmatpush1.bf16.msra.mxu1 %v3354_v1  ;;  %1295 = vmatprep.mubr.f32.mxu1 %v3192_v2 }
 0x18e   :  { %2905 = vmatprep.subr.bf16.mxu1 %v3388_v50 }
 0x190   :  { %1297 = vmatmul.mubr.f32.gmra.mrb[10].mxu1 %v3311_v10 }
 0x191   :  { %2907 = vmatpush1.bf16.msra.mxu1 %v3382_v45  ;;  %1302 = vmatprep.mubr.f32.mxu1 %v3192_v2 }
 0x192   :  { %2846 = vmatprep.subr.msk.mxu1 %vm13_vm2, %v3193_v5 }
 0x194   :  { %1304 = vmatmul.mubr.f32.gmra.mrb[12].mxu1 %v3339_v43 }
 0x195   :  { %1309 = vmatprep.mubr.f32.mxu1 %v3192_v2  ;;  %2847 = vmatpush1.msk.msra.mxu1 %vm13_vm2, %v3193_v5 }
 0x198   :  { %1311 = vmatmul.mubr.f32.gmra.mrb[14].mxu1 %v3391_v55 }
 0x199   :  { %1391 = vmatprep.mubr.f32.mxu1 %v3192_v2 }
 0x19c   :  { %1393 = vmatmul.mubr.f32.vlgmr.msra.gmra.mrb[8].mxu1 %v3305_v63 }
 0x19d   :  { %1398 = vmatprep.mubr.f32.mxu1 %v3192_v2 }
 0x1a0   :  { %1400 = vmatmul.mubr.f32.gmra.mrb[10].mxu1 %v3311_v10  ;;  %v1465_v10 = vsel %vm691_vm1, %v1460_v19, 0 }
 0x1a1   :  { %1405 = vmatprep.mubr.f32.mxu1 %v3192_v2  ;;  %v3516_v6 = vand.u32 4294901760, %v1465_v10 }
 0x1a3   :  { %v3520_v35 = vsub.f32 %v1465_v10, %v3516_v6 }
 0x1a4   :  { %1407 = vmatmul.mubr.f32.gmra.mrb[12].mxu1 %v3339_v43 }
 0x1a5   :  { %1412 = vmatprep.mubr.f32.mxu1 %v3192_v2  ;;  %v1553_v50 = vand.u32 4294901760, %v3520_v35 }
 0x1a7   :  { %v3540_v8 = vsub.f32 %v3520_v35, %v1553_v50 }
 0x1a8   :  { %1414 = vmatmul.mubr.f32.gmra.mrb[14].mxu1 %v3391_v55 }
 0x1a9   :  { %2310 = vmatprep.mubr.f32.mxu1 %v3192_v2 }
 0x26f   :  { %v1394_v9 = vpop.f32.mrb[8].mxu1 }
 0x270   :  { %v1428_v63 = vmul.f32 0.70710677, %v1394_v9  ;;  %v1396_v20 = vpop.f32.mrb[9].mxu1  ;;  %v1420_v45 = vmul.f32 0.5, %v1394_v9 }
 0x271   :  { %v1429_v39 = vmul.f32 0.70710677, %v1396_v20  ;;  %v1421_v53 = vmul.f32 0.5, %v1396_v20 }
 0x272   :  { %3152 = verf.f32 %v1428_v63 }
 0x273   :  { %3154 = verf.f32 %v1429_v39  ;;  %v1401_v44 = vpop.f32.mrb[10].mxu1 }
 0x274   :  { %v1430_v43 = vmul.f32 0.70710677, %v1401_v44  ;;  %v1403_v52 = vpop.f32.mrb[11].mxu1  ;;  %v1422_v3 = vmul.f32 0.5, %v1401_v44 }
 0x275   :  { %v1431_v1 = vmul.f32 0.70710677, %v1403_v52  ;;  %v1423_v12 = vmul.f32 0.5, %v1403_v52 }
 0x276   :  { %3156 = verf.f32 %v1430_v43 }
 0x277   :  { %3158 = verf.f32 %v1431_v1  ;;  %v1408_v7 = vpop.f32.mrb[12].mxu1 }
 0x278   :  { %v1432_v31 = vmul.f32 0.70710677, %v1408_v7  ;;  %v1410_v33 = vpop.f32.mrb[13].mxu1  ;;  %v1424_v47 = vmul.f32 0.5, %v1408_v7 }
 0x279   :  { %v1433_v34 = vmul.f32 0.70710677, %v1410_v33  ;;  %v1425_v24 = vmul.f32 0.5, %v1410_v33 }
 0x27a   :  { %3160 = verf.f32 %v1432_v31 }
 0x27b   :  { %3162 = verf.f32 %v1433_v34  ;;  %v1415_v37 = vpop.f32.mrb[14].mxu1 }
 0x27c   :  { %v3153_v38 = vpop.eup %3152  ;;  %v1434_v40 = vmul.f32 0.70710677, %v1415_v37  ;;  %v1417_v41 = vpop.f32.mrb[15].mxu1  ;;  %v1426_v19 = vmul.f32 0.5, %v1415_v37 }
 0x27d   :  { %v3155_v42 = vpop.eup %3154  ;;  %v1444_v48 = vadd.f32 1.0, %v3153_v38  ;;  %v1435_v49 = vmul.f32 0.70710677, %v1417_v41  ;;  %v1427_v39 = vmul.f32 0.5, %v1417_v41 }
 0x27e   :  { %v1445_v55 = vadd.f32 1.0, %v3155_v42  ;;  %3164 = verf.f32 %v1434_v40 }
 0x27f   :  { %v1452_v57 = vmul.f32 %v1444_v48, %v1420_v45  ;;  %3166 = verf.f32 %v1435_v49 }
 0x280   :  { %v3157_v54 = vpop.eup %3156  ;;  %v1453_v58 = vmul.f32 %v1445_v55, %v1421_v53 }
 0x281   :  { %v3159_v61 = vpop.eup %3158  ;;  %v1478_v0 = vand.u32 4294901760, %v1452_v57  ;;  %v1446_v4 = vadd.f32 1.0, %v3157_v54 }
 0x282   :  { %v1476_v11 = vand.u32 4294901760, %v1453_v58  ;;  %v1447_v32 = vadd.f32 1.0, %v3159_v61 }
 0x283   :  { %v3543_v15 = vsub.f32 %v1452_v57, %v1478_v0  ;;  %v1454_v16 = vmul.f32 %v1446_v4, %v1422_v3 }
 0x284   :  { %v3161_v21 = vpop.eup %3160  ;;  %v3551_v22 = vsub.f32 %v1453_v58, %v1476_v11  ;;  %v1455_v23 = vmul.f32 %v1447_v32, %v1423_v12 }
 0x285   :  { %v3163_v27 = vpop.eup %3162  ;;  %v1603_v28 = vand.u32 4294901760, %v3543_v15  ;;  %v1482_v30 = vand.u32 4294901760, %v1454_v16  ;;  %v1448_v9 = vadd.f32 1.0, %v3161_v21 }
 0x286   :  { %v1480_v63 = vand.u32 4294901760, %v1455_v23  ;;  %v1449_v20 = vadd.f32 1.0, %v3163_v27  ;;  %v1597_v10 = vand.u32 4294901760, %v3551_v22 }
 0x287   :  { %v3555_v44 = vsub.f32 %v1454_v16, %v1482_v30  ;;  %v1456_v43 = vmul.f32 %v1448_v9, %v1424_v47  ;;  %v3557_v52 = vpack.c.bf16 %v1482_v30, %v1478_v0  ;;  %v1604_v62 = vsub.f32 %v3543_v15, %v1603_v28 }
 0x288   :  { %v3165_v1 = vpop.eup %3164  ;;  %v3560_v7 = vsub.f32 %v1455_v23, %v1480_v63  ;;  %v1457_v26 = vmul.f32 %v1449_v20, %v1425_v24  ;;  %v3562_v31 = vpack.c.bf16 %v1480_v63, %v1476_v11  ;;  %v1598_v33 = vsub.f32 %v3551_v22, %v1597_v10 }
 0x289   :  { %v3167_v34 = vpop.eup %3166  ;;  %v1615_v37 = vand.u32 4294901760, %v3555_v44  ;;  %v1486_v38 = vand.u32 4294901760, %v1456_v43  ;;  %v1450_v40 = vadd.f32 1.0, %v3165_v1  ;;  %v1605_v41 = vand.u32 4294901760, %v1604_v62 }
 0x28a   :  { %v1484_v42 = vand.u32 4294901760, %v1457_v26  ;;  %v1451_v45 = vadd.f32 1.0, %v3167_v34  ;;  %2909 = vmatprep.subr.bf16.mxu0 %v3562_v31  ;;  %v1599_v48 = vand.u32 4294901760, %v1598_v33  ;;  %v1609_v49 = vand.u32 4294901760, %v3560_v7 }
 0x28b   :  { %v3568_v51 = vsub.f32 %v1456_v43, %v1486_v38  ;;  %v1458_v53 = vmul.f32 %v1450_v40, %v1426_v19  ;;  %2911 = vmatpush1.bf16.msra.mxu0 %v3557_v52  ;;  %v1616_v55 = vsub.f32 %v3555_v44, %v1615_v37  ;;  %v2924_v57 = vpack.c.bf16 %v3560_v7, %v3551_v22 }
 0x28c   :  { %v3574_v54 = vsub.f32 %v1457_v26, %v1484_v42  ;;  %v1459_v58 = vmul.f32 %v1451_v45, %v1427_v39  ;;  %v1610_v60 = vsub.f32 %v3560_v7, %v1609_v49  ;;  %v2926_v61 = vpack.c.bf16 %v3555_v44, %v3543_v15 }
 0x28d   :  { %v1627_v0 = vand.u32 4294901760, %v3568_v51  ;;  %v1490_v3 = vand.u32 4294901760, %v1458_v53  ;;  %v1617_v4 = vand.u32 4294901760, %v1616_v55  ;;  %v3580_v11 = vpack.c.bf16 %v1609_v49, %v1597_v10 }
 0x28e   :  { %v1488_v12 = vand.u32 4294901760, %v1459_v58  ;;  %v1611_v32 = vand.u32 4294901760, %v1610_v60  ;;  %v1621_v16 = vand.u32 4294901760, %v3574_v54  ;;  %v3583_v21 = vpack.c.bf16 %v1615_v37, %v1603_v28 }
 0x28f   :  { %v1638_v22 = vsub.f32 %v1458_v53, %v1490_v3  ;;  %v3585_v23 = vpack.c.bf16 %v1490_v3, %v1486_v38  ;;  %v2918_v47 = vpack.c.bf16 %v1617_v4, %v1605_v41  ;;  %v3589_v24 = vsub.f32 %v3532_v59, %v3546_v17 }
 0x290   :  { %v1632_v15 = vsub.f32 %v1459_v58, %v1488_v12  ;;  %v3591_v27 = vpack.c.bf16 %v1488_v12, %v1484_v42  ;;  %v2916_v30 = vpack.c.bf16 %v1611_v32, %v1599_v48  ;;  %v3594_v9 = vand.u32 4294901760, %v3549_v18 }
 0x291   :  { %v1639_v19 = vand.u32 4294901760, %v1638_v22  ;;  %v1628_v63 = vsub.f32 %v3568_v51, %v1627_v0  ;;  %v2930_v28 = vpack.c.bf16 %v1638_v22, %v3568_v51  ;;  %v1622_v20 = vsub.f32 %v3574_v54, %v1621_v16 }
 0x292   :  { %2913 = vmatprep.subr.bf16.mxu0 %v3591_v27  ;;  %v1633_v39 = vand.u32 4294901760, %v1632_v15  ;;  %v2928_v59 = vpack.c.bf16 %v1632_v15, %v3574_v54  ;;  %v1555_v10 = vand.u32 4294901760, %v3540_v8  ;;  %v1565_v44 = vsub.f32 %v3529_v56, %v1564_v14 }
 0x293   :  { %2915 = vmatpush1.bf16.msra.mxu0 %v3585_v23  ;;  %v1640_v43 = vsub.f32 %v1638_v22, %v1639_v19  ;;  %v3606_v62 = vpack.c.bf16 %v1639_v19, %v1627_v0  ;;  %v1575_v7 = vand.u32 4294901760, %v3589_v24  ;;  %v3614_v26 = vsub.f32 %v3549_v18, %v3594_v9 }
 0x294   :  { %2848 = vmatprep.subr.msk.mxu0 %vm13_vm2, %v3193_v5  ;;  %v1634_v1 = vsub.f32 %v1632_v15, %v1633_v39  ;;  %v2944_v33 = vpack.c.bf16 %v1633_v39, %v1621_v16  ;;  %v1629_v8 = vand.u32 4294901760, %v1628_v63  ;;  %v1623_v37 = vand.u32 4294901760, %v1622_v20 }
 0x295   :  { %v1641_v34 = vand.u32 4294901760, %v1640_v43  ;;  %v1566_v42 = vand.u32 4294901760, %v1565_v44  ;;  %v1576_v45 = vsub.f32 %v3589_v24, %v1575_v7  ;;  %v1586_v18 = vand.u32 4294901760, %v3614_v26 }
 0x296   :  { %v1635_v38 = vand.u32 4294901760, %v1634_v1 }
 0x297   :  { %2849 = vmatpush1.msk.msra.mxu0 %vm13_vm2, %v3193_v5  ;;  %v2922_v40 = vpack.c.bf16 %v1641_v34, %v1629_v8  ;;  %v1577_v48 = vand.u32 4294901760, %v1576_v45  ;;  %v1587_v49 = vsub.f32 %v3614_v26, %v1586_v18 }
 0x298   :  { %1556 = vmatmul.mubr.f32.vlgmr.msra.gmra.mrb[8].mxu0 %v1555_v10  ;;  %2917 = vmatprep.subr.bf16.mxu0 %v2916_v30  ;;  %v2920_v41 = vpack.c.bf16 %v1635_v38, %v1623_v37 }
 0x299   :  { %2919 = vmatpush1.bf16.msra.mxu0 %v2918_v47  ;;  %1561 = vmatprep.mubr.f32.mxu0 %v3192_v2  ;;  %v1588_v51 = vand.u32 4294901760, %v1587_v49 }
 0x29a   :  { %2921 = vmatprep.subr.bf16.mxu0 %v2920_v41 }
 0x29c   :  { %1567 = vmatmul.mubr.f32.gmra.mrb[10].mxu0 %v1566_v42 }
 0x29d   :  { %2923 = vmatpush1.bf16.msra.mxu0 %v2922_v40  ;;  %1572 = vmatprep.mubr.f32.mxu0 %v3192_v2 }
 0x29e   :  { %1648 = vmatprep.subr.mxu0 %v3426_v25 }
 0x2a0   :  { %1578 = vmatmul.mubr.f32.gmra.mrb[12].mxu0 %v1577_v48 }
 0x2a1   :  { %1654 = vmatpush1.msra.mxu0 %v3426_v25  ;;  %1583 = vmatprep.mubr.f32.mxu0 %v3192_v2 }
 0x2a2   :  { %2925 = vmatprep.subr.bf16.mxu0 %v2924_v57 }
 0x2a4   :  { %1589 = vmatmul.mubr.f32.gmra.mrb[14].mxu0 %v1588_v51 }
 0x2a5   :  { %1709 = vmatprep.mubr.f32.mxu0 %v3192_v2 }
 0x2a8   :  { %1711 = vmatmul.mubr.f32.vlgmr.msra.gmra.mrb[8].mxu0 %v3516_v6 }
 0x2a9   :  { %2927 = vmatpush1.bf16.msra.mxu0 %v2926_v61  ;;  %1716 = vmatprep.mubr.f32.mxu0 %v3192_v2 }
 0x2aa   :  { %2929 = vmatprep.subr.bf16.mxu0 %v2928_v59 }
 0x2ac   :  { %1718 = vmatmul.mubr.f32.gmra.mrb[10].mxu0 %v3522_v36 }
 0x2ad   :  { %2931 = vmatpush1.bf16.msra.mxu0 %v2930_v28  ;;  %1723 = vmatprep.mubr.f32.mxu0 %v3192_v2 }
 0x2ae   :  { %1764 = vmatprep.subr.mxu0 %v3343_v46 }
 0x2b0   :  { %1725 = vmatmul.mubr.f32.gmra.mrb[12].mxu0 %v3546_v17 }
 0x2b1   :  { %1767 = vmatpush1.msra.mxu0 %v3343_v46  ;;  %1730 = vmatprep.mubr.f32.mxu0 %v3192_v2 }
 0x2b2   :  { %2933 = vmatprep.subr.bf16.mxu0 %v3562_v31 }
 0x2b4   :  { %1732 = vmatmul.mubr.f32.gmra.mrb[14].mxu0 %v3594_v9 }
 0x2b5   :  { %1822 = vmatprep.mubr.f32.mxu0 %v3192_v2 }
 0x2b8   :  { %1825 = vmatmul.mubr.f32.vlgmr.msra.gmra.mrb[8].mxu0 %v3520_v35 }
 0x2b9   :  { %2935 = vmatpush1.bf16.msra.mxu0 %v3557_v52  ;;  %1830 = vmatprep.mubr.f32.mxu0 %v3192_v2 }
 0x2ba   :  { %2937 = vmatprep.subr.bf16.mxu0 %v3591_v27 }
 0x2bc   :  { %1833 = vmatmul.mubr.f32.gmra.mrb[10].mxu0 %v3529_v56 }
 0x2bd   :  { %2939 = vmatpush1.bf16.msra.mxu0 %v3585_v23  ;;  %1838 = vmatprep.mubr.f32.mxu0 %v3192_v2 }
 0x2be   :  { %2850 = vmatprep.subr.msk.mxu0 %vm13_vm2, %v3193_v5 }
 0x2c0   :  { %1841 = vmatmul.mubr.f32.gmra.mrb[12].mxu0 %v3589_v24 }
 0x2c1   :  { %2851 = vmatpush1.msk.msra.mxu0 %vm13_vm2, %v3193_v5  ;;  %1846 = vmatprep.mubr.f32.mxu0 %v3192_v2 }
 0x2c2   :  { %2941 = vmatprep.subr.bf16.mxu0 %v3580_v11 }
 0x2c4   :  { %1849 = vmatmul.mubr.f32.gmra.mrb[14].mxu0 %v3614_v26 }
 0x2c5   :  { %1929 = vmatprep.mubr.f32.mxu0 %v3192_v2 }
 0x2c8   :  { %1933 = vmatmul.mubr.f32.vlgmr.msra.gmra.mrb[8].mxu0 %v1553_v50 }
 0x2c9   :  { %2943 = vmatpush1.bf16.msra.mxu0 %v3583_v21  ;;  %1938 = vmatprep.mubr.f32.mxu0 %v3192_v2 }
 0x2ca   :  { %2945 = vmatprep.subr.bf16.mxu0 %v2944_v33 }
 0x2cc   :  { %1942 = vmatmul.mubr.f32.gmra.mrb[10].mxu0 %v1564_v14 }
 0x2cd   :  { %2947 = vmatpush1.bf16.msra.mxu0 %v3606_v62  ;;  %1947 = vmatprep.mubr.f32.mxu0 %v3192_v2 }
 0x2ce   :  { %2001 = vmatprep.subr.mxu0 %v3398_v29 }
 0x2d0   :  { %1951 = vmatmul.mubr.f32.gmra.mrb[12].mxu0 %v1575_v7 }
 0x2d1   :  { %2005 = vmatpush1.msra.mxu0 %v3398_v29  ;;  %1956 = vmatprep.mubr.f32.mxu0 %v3192_v2 }
 0x2d2   :  { %2949 = vmatprep.subr.bf16.mxu0 %v3562_v31 }
 0x2d4   :  { %1960 = vmatmul.mubr.f32.gmra.mrb[14].mxu0 %v1586_v18 }
 0x2d5   :  { %2060 = vmatprep.mubr.f32.mxu0 %v3192_v2 }
 0x2d8   :  { %2062 = vmatmul.mubr.f32.vlgmr.msra.gmra.mrb[8].mxu0 %v3516_v6 }
 0x2d9   :  { %2951 = vmatpush1.bf16.msra.mxu0 %v3557_v52  ;;  %2067 = vmatprep.mubr.f32.mxu0 %v3192_v2 }
 0x2da   :  { %2953 = vmatprep.subr.bf16.mxu0 %v3591_v27 }
 0x2dc   :  { %2069 = vmatmul.mubr.f32.gmra.mrb[10].mxu0 %v3522_v36 }
 0x2dd   :  { %2955 = vmatpush1.bf16.msra.mxu0 %v3585_v23  ;;  %2074 = vmatprep.mubr.f32.mxu0 %v3192_v2 }
 0x2de   :  { %2852 = vmatprep.subr.msk.mxu0 %vm13_vm2, %v3193_v5 }
 0x2e0   :  { %2076 = vmatmul.mubr.f32.gmra.mrb[12].mxu0 %v3546_v17 }
 0x2e1   :  { %2081 = vmatprep.mubr.f32.mxu0 %v3192_v2  ;;  %2853 = vmatpush1.msk.msra.mxu0 %vm13_vm2, %v3193_v5 }
 0x2e4   :  { %2083 = vmatmul.mubr.f32.gmra.mrb[14].mxu0 %v3594_v9 }
 0x2e5   :  { %2163 = vmatprep.mubr.f32.mxu0 %v3192_v2 }
 0x2e8   :  { %2165 = vmatmul.mubr.f32.vlgmr.msra.gmra.mrb[8].mxu0 %v3516_v6 }
 0x2e9   :  { %2170 = vmatprep.mubr.f32.mxu0 %v3192_v2 }
 0x2ec   :  { %2172 = vmatmul.mubr.f32.gmra.mrb[10].mxu0 %v3522_v36  ;;  %v2232_v36 = vld [vmem:[%s3788_s1 + $0x60] sm:$0xff] }
 0x2ed   :  { %2177 = vmatprep.mubr.f32.mxu0 %v3192_v2  ;;  %v2234_v54 = vsel %vm691_vm1, %v2232_v36, 0 }
 0x2ee   :  { %v3702_v61 = vand.u32 4294901760, %v2234_v54 }
 0x2f0   :  { %2179 = vmatmul.mubr.f32.gmra.mrb[12].mxu0 %v3546_v17  ;;  %v3705_v47 = vsub.f32 %v2234_v54, %v3702_v61 }
 0x2f1   :  { %2184 = vmatprep.mubr.f32.mxu0 %v3192_v2 }
 0x2f2   :  { %v2313_v10 = vand.u32 4294901760, %v3705_v47 }
 0x2f4   :  { %2186 = vmatmul.mubr.f32.gmra.mrb[14].mxu0 %v3594_v9 }
 0x3bb   :  { %v2166_v35 = vpop.f32.mrb[8].mxu0 }
 0x3bc   :  { %v2200_v50 = vmul.f32 0.70710677, %v2166_v35  ;;  %v2168_v56 = vpop.f32.mrb[9].mxu0  ;;  %v2192_v12 = vmul.f32 0.5, %v2166_v35 }
 0x3bd   :  { %v2201_v14 = vmul.f32 0.70710677, %v2168_v56  ;;  %v2193_v21 = vmul.f32 0.5, %v2168_v56 }
 0x3be   :  { %3168 = verf.f32 %v2200_v50 }
 0x3bf   :  { %3170 = verf.f32 %v2201_v14  ;;  %v2173_v52 = vpop.f32.mrb[10].mxu0 }
 0x3c0   :  { %v2202_v6 = vmul.f32 0.70710677, %v2173_v52  ;;  %v2175_v31 = vpop.f32.mrb[11].mxu0  ;;  %v2194_v9 = vmul.f32 0.5, %v2173_v52 }
 0x3c1   :  { %v2203_v53 = vmul.f32 0.70710677, %v2175_v31  ;;  %v2195_v28 = vmul.f32 0.5, %v2175_v31 }
 0x3c2   :  { %3172 = verf.f32 %v2202_v6 }
 0x3c3   :  { %3174 = verf.f32 %v2203_v53  ;;  %v2180_v17 = vpop.f32.mrb[12].mxu0 }
 0x3c4   :  { %v2204_v55 = vmul.f32 0.70710677, %v2180_v17  ;;  %v2182_v57 = vpop.f32.mrb[13].mxu0  ;;  %v2196_v1 = vmul.f32 0.5, %v2180_v17 }
 0x3c5   :  { %v2205_v58 = vmul.f32 0.70710677, %v2182_v57  ;;  %v2197_v7 = vmul.f32 0.5, %v2182_v57 }
 0x3c6   :  { %3176 = verf.f32 %v2204_v55 }
 0x3c7   :  { %3178 = verf.f32 %v2205_v58  ;;  %v2187_v60 = vpop.f32.mrb[14].mxu0 }
 0x3c8   :  { %v3169_v0 = vpop.eup %3168  ;;  %v2206_v3 = vmul.f32 0.70710677, %v2187_v60  ;;  %v2189_v4 = vpop.f32.mrb[15].mxu0  ;;  %v2198_v37 = vmul.f32 0.5, %v2187_v60 }
 0x3c9   :  { %v3171_v11 = vpop.eup %3170  ;;  %v2216_v32 = vadd.f32 1.0, %v3169_v0  ;;  %v2207_v16 = vmul.f32 0.70710677, %v2189_v4  ;;  %v2199_v41 = vmul.f32 0.5, %v2189_v4 }
 0x3ca   :  { %v2217_v22 = vadd.f32 1.0, %v3171_v11  ;;  %3180 = verf.f32 %v2206_v3 }
 0x3cb   :  { %v2224_v23 = vmul.f32 %v2216_v32, %v2192_v12  ;;  %3182 = verf.f32 %v2207_v16 }
 0x3cc   :  { %v3173_v24 = vpop.eup %3172  ;;  %v2225_v15 = vmul.f32 %v2217_v22, %v2193_v21 }
 0x3cd   :  { %v3175_v27 = vpop.eup %3174  ;;  %v2238_v30 = vand.u32 4294901760, %v2224_v23  ;;  %v2218_v19 = vadd.f32 1.0, %v3173_v24 }
 0x3ce   :  { %v2236_v63 = vand.u32 4294901760, %v2225_v15  ;;  %v2219_v20 = vadd.f32 1.0, %v3175_v27 }
 0x3cf   :  { %v3707_v39 = vsub.f32 %v2224_v23, %v2238_v30  ;;  %v2226_v59 = vmul.f32 %v2218_v19, %v2194_v9 }
 0x3d0   :  { %v3177_v44 = vpop.eup %3176  ;;  %v3710_v43 = vsub.f32 %v2225_v15, %v2236_v63  ;;  %v2227_v62 = vmul.f32 %v2219_v20, %v2195_v28 }
 0x3d1   :  { %v3179_v26 = vpop.eup %3178  ;;  %v2330_v33 = vand.u32 4294901760, %v3707_v39  ;;  %v2242_v8 = vand.u32 4294901760, %v2226_v59  ;;  %v2220_v34 = vadd.f32 1.0, %v3177_v44  ;;  %v2314_v44 = vsub.f32 %v3705_v47, %v2313_v10 }
 0x3d2   :  { %v2240_v38 = vand.u32 4294901760, %v2227_v62  ;;  %v2221_v40 = vadd.f32 1.0, %v3179_v26  ;;  %v2324_v42 = vand.u32 4294901760, %v3710_v43 }
 0x3d3   :  { %v3714_v45 = vsub.f32 %v2226_v59, %v2242_v8  ;;  %v2228_v18 = vmul.f32 %v2220_v34, %v2196_v1  ;;  %v3716_v48 = vpack.c.bf16 %v2242_v8, %v2238_v30  ;;  %v2331_v49 = vsub.f32 %v3707_v39, %v2330_v33 }
 0x3d4   :  { %v3181_v51 = vpop.eup %3180  ;;  %v3719_v35 = vsub.f32 %v2227_v62, %v2240_v38  ;;  %v2229_v50 = vmul.f32 %v2221_v40, %v2197_v7  ;;  %v3721_v56 = vpack.c.bf16 %v2240_v38, %v2236_v63  ;;  %v2325_v14 = vsub.f32 %v3710_v43, %v2324_v42 }
 0x3d5   :  { %v3183_v52 = vpop.eup %3182  ;;  %v2342_v6 = vand.u32 4294901760, %v3714_v45  ;;  %v2246_v31 = vand.u32 4294901760, %v2228_v18  ;;  %v2222_v53 = vadd.f32 1.0, %v3181_v51  ;;  %v2332_v36 = vand.u32 4294901760, %v2331_v49 }
 0x3d6   :  { %v2244_v17 = vand.u32 4294901760, %v2229_v50  ;;  %v2223_v55 = vadd.f32 1.0, %v3183_v52  ;;  %2957 = vmatprep.subr.bf16.mxu1 %v3721_v56  ;;  %v2326_v57 = vand.u32 4294901760, %v2325_v14  ;;  %v2336_v54 = vand.u32 4294901760, %v3719_v35 }
 0x3d7   :  { %v2353_v58 = vsub.f32 %v2228_v18, %v2246_v31  ;;  %v2230_v60 = vmul.f32 %v2222_v53, %v2198_v37  ;;  %2959 = vmatpush1.bf16.msra.mxu1 %v3716_v48  ;;  %v2343_v0 = vsub.f32 %v3714_v45, %v2342_v6  ;;  %v2972_v3 = vpack.c.bf16 %v3719_v35, %v3710_v43 }
 0x3d8   :  { %v2347_v4 = vsub.f32 %v2229_v50, %v2244_v17  ;;  %v2231_v11 = vmul.f32 %v2223_v55, %v2199_v41  ;;  %v2337_v12 = vsub.f32 %v3719_v35, %v2336_v54  ;;  %v2974_v32 = vpack.c.bf16 %v3714_v45, %v3707_v39 }
 0x3d9   :  { %v2354_v16 = vand.u32 4294901760, %v2353_v58  ;;  %v2250_v21 = vand.u32 4294901760, %v2230_v60  ;;  %v2344_v22 = vand.u32 4294901760, %v2343_v0  ;;  %v2988_v23 = vpack.c.bf16 %v2336_v54, %v2324_v42 }
 0x3da   :  { %v2248_v24 = vand.u32 4294901760, %v2231_v11  ;;  %v2338_v15 = vand.u32 4294901760, %v2337_v12  ;;  %v2348_v27 = vand.u32 4294901760, %v2347_v4  ;;  %v2990_v30 = vpack.c.bf16 %v2342_v6, %v2330_v33 }
 0x3db   :  { %v2365_v9 = vsub.f32 %v2230_v60, %v2250_v21  ;;  %v3734_v19 = vpack.c.bf16 %v2250_v21, %v2246_v31  ;;  %v2966_v63 = vpack.c.bf16 %v2344_v22, %v2332_v36  ;;  %v2355_v43 = vsub.f32 %v2353_v58, %v2354_v16 }
 0x3dc   :  { %v2359_v28 = vsub.f32 %v2231_v11, %v2248_v24  ;;  %v2960_v20 = vpack.c.bf16 %v2248_v24, %v2244_v17  ;;  %v2964_v59 = vpack.c.bf16 %v2338_v15, %v2326_v57  ;;  %v2349_v1 = vsub.f32 %v2347_v4, %v2348_v27 }
 0x3dd   :  { %v2366_v39 = vand.u32 4294901760, %v2365_v9  ;;  %v2978_v62 = vpack.c.bf16 %v2365_v9, %v2353_v58  ;;  %v2315_v34 = vand.u32 4294901760, %v2314_v44  ;;  %v2356_v40 = vand.u32 4294901760, %v2355_v43 }
 0x3de   :  { %2961 = vmatprep.subr.bf16.mxu1 %v2960_v20  ;;  %v2360_v7 = vand.u32 4294901760, %v2359_v28  ;;  %v2976_v26 = vpack.c.bf16 %v2359_v28, %v2347_v4  ;;  %v2350_v42 = vand.u32 4294901760, %v2349_v1 }
 0x3df   :  { %2963 = vmatpush1.bf16.msra.mxu1 %v3734_v19  ;;  %v2367_v33 = vsub.f32 %v2365_v9, %v2366_v39  ;;  %v2994_v8 = vpack.c.bf16 %v2366_v39, %v2354_v16 }
 0x3e0   :  { %2854 = vmatprep.subr.msk.mxu1 %vm13_vm2, %v3193_v5  ;;  %v2361_v37 = vsub.f32 %v2359_v28, %v2360_v7  ;;  %v2992_v38 = vpack.c.bf16 %v2360_v7, %v2348_v27 }
 0x3e1   :  { %v2368_v41 = vand.u32 4294901760, %v2367_v33 }
 0x3e2   :  { %v2362_v45 = vand.u32 4294901760, %v2361_v37 }
 0x3e3   :  { %2855 = vmatpush1.msk.msra.mxu1 %vm13_vm2, %v3193_v5  ;;  %v2970_v18 = vpack.c.bf16 %v2368_v41, %v2356_v40 }
 0x3e4   :  { %2965 = vmatprep.subr.bf16.mxu1 %v2964_v59  ;;  %2316 = vmatmul.mubr.f32.vlgmr.msra.gmra.mrb[16].mxu1 %v2315_v34  ;;  %v2968_v49 = vpack.c.bf16 %v2362_v45, %v2350_v42 }
 0x3e5   :  { %2967 = vmatpush1.bf16.msra.mxu1 %v2966_v63  ;;  %2436 = vmatprep.mubr.f32.mxu1 %v3192_v2 }
 0x3e6   :  { %2969 = vmatprep.subr.bf16.mxu1 %v2968_v49 }
 0x3e9   :  { %2971 = vmatpush1.bf16.msra.mxu1 %v2970_v18 }
 0x3ea   :  { %2375 = vmatprep.subr.mxu1 %v3426_v25 }
 0x3ed   :  { %2381 = vmatpush1.msra.mxu1 %v3426_v25 }
 0x3ee   :  { %2973 = vmatprep.subr.bf16.mxu1 %v2972_v3  ;;  %2438 = vmatmul.mubr.f32.vlgmr.msra.gmra.mrb[16].mxu1 %v3702_v61 }
 0x3ef   :  { %2975 = vmatpush1.bf16.msra.mxu1 %v2974_v32  ;;  %2528 = vmatprep.mubr.f32.mxu1 %v3192_v2 }
 0x3f0   :  { %2977 = vmatprep.subr.bf16.mxu1 %v2976_v26 }
 0x3f3   :  { %2979 = vmatpush1.bf16.msra.mxu1 %v2978_v62 }
 0x3f4   :  { %2470 = vmatprep.subr.mxu1 %v3343_v46 }
 0x3f7   :  { %2473 = vmatpush1.msra.mxu1 %v3343_v46 }
 0x3f8   :  { %2981 = vmatprep.subr.bf16.mxu1 %v3721_v56  ;;  %2531 = vmatmul.mubr.f32.vlgmr.msra.gmra.mrb[16].mxu1 %v3705_v47 }
 0x3f9   :  { %2983 = vmatpush1.bf16.msra.mxu1 %v3716_v48  ;;  %2611 = vmatprep.mubr.f32.mxu1 %v3192_v2 }
 0x3fa   :  { %2985 = vmatprep.subr.bf16.mxu1 %v2960_v20 }
 0x3fd   :  { %2987 = vmatpush1.bf16.msra.mxu1 %v3734_v19 }
 0x3fe   :  { %2856 = vmatprep.subr.msk.mxu1 %vm13_vm2, %v3193_v5 }
 0x401   :  { %2857 = vmatpush1.msk.msra.mxu1 %vm13_vm2, %v3193_v5 }
 0x402   :  { %2989 = vmatprep.subr.bf16.mxu1 %v2988_v23  ;;  %2615 = vmatmul.mubr.f32.vlgmr.msra.gmra.mrb[16].mxu1 %v2313_v10 }
 0x403   :  { %2991 = vmatpush1.bf16.msra.mxu1 %v2990_v30  ;;  %2715 = vmatprep.mubr.f32.mxu1 %v3192_v2 }
 0x404   :  { %2993 = vmatprep.subr.bf16.mxu1 %v2992_v38 }
 0x407   :  { %2995 = vmatpush1.bf16.msra.mxu1 %v2994_v8 }
 0x408   :  { %2656 = vmatprep.subr.mxu1 %v3398_v29 }
 0x40b   :  { %2660 = vmatpush1.msra.mxu1 %v3398_v29 }
 0x40c   :  { %2997 = vmatprep.subr.bf16.mxu1 %v3721_v56  ;;  %2717 = vmatmul.mubr.f32.vlgmr.msra.gmra.mrb[16].mxu1 %v3702_v61 }
 0x40d   :  { %2999 = vmatpush1.bf16.msra.mxu1 %v3716_v48  ;;  %2797 = vmatprep.mubr.f32.mxu1 %v3192_v2 }
 0x40e   :  { %3001 = vmatprep.subr.bf16.mxu1 %v2960_v20 }
 0x411   :  { %3003 = vmatpush1.bf16.msra.mxu1 %v3734_v19 }
 0x412   :  { %2858 = vmatprep.subr.msk.mxu1 %vm13_vm2, %v3193_v5 }
 0x415   :  { %2859 = vmatpush1.msk.msra.mxu1 %vm13_vm2, %v3193_v5 }
 0x416   :  { %2799 = vmatmul.mubr.f32.vlgmr.msra.gmra.mrb[16].mxu1 %v3702_v61 }
 0x4e9   :  { %v2800_v46 = vpop.f32.mrb[16].mxu1 }
 0x4ea   :  { %v2807_v29 = vand.u32 2147483647, %v2800_v46  ;;  %v2802_v25 = vpop.f32.mrb[17].mxu1  ;;  %v2805_v57 = vmax.f32 %v2800_v46, 0.0 }
 0x4eb   :  { %v2808_v47 = vand.u32 2147483647, %v2802_v25  ;;  %v2806_v0 = vmax.f32 %v2802_v25, 0.0 }
 0x4ec   :  { %v2809_v10 = vsub.f32 0.0, %v2807_v29 }
 0x4ed   :  { %v2810_v48 = vsub.f32 0.0, %v2808_v47 }
 0x4ee   :  { %v2811_v2 = vmul.f32 1.442695, %v2809_v10 }
 0x4ef   :  { %v2813_v51 = vmul.f32 1.442695, %v2810_v48 }
 0x4f0   :  { %3184 = vpow2.f32 %v2811_v2 }
 0x4f1   :  { %3186 = vpow2.f32 %v2813_v51 }
 0x4fa   :  { %v3185_v35 = vpop.eup %3184 }
 0x4fb   :  { %v3187_v50 = vpop.eup %3186  ;;  %v2815_v56 = vadd.f32 1.0, %v3185_v35  ;;  %v2818_v13 = vmul.f32 -0.5, %v3185_v35  ;;  %v2821_v61 = vand.u32 2147483647, %v3185_v35 }
 0x4fc   :  { %v2824_v14 = vadd.f32 1.0, %v3187_v50  ;;  %v2827_v5 = vmul.f32 -0.5, %v3187_v50  ;;  %v2830_v31 = vand.u32 2147483647, %v3187_v50 }
 0x4fd   :  { %3188 = vlog2.f32 %v2815_v56  ;;  %v2819_v52 = vadd.f32 1.0, %v2818_v13  ;;  %vm2822_vm3 = vcmp.lt.f32.partialorder %v2821_v61, 0.0004427343 }
 0x4fe   :  { %3190 = vlog2.f32 %v2824_v14  ;;  %v2828_v6 = vadd.f32 1.0, %v2827_v5  ;;  %vm2831_vm4 = vcmp.lt.f32.partialorder %v2830_v31, 0.0004427343 }
 0x4ff   :  { %v2820_v55 = vmul.f32 %v3185_v35, %v2819_v52 }
 0x500   :  { %v2829_v58 = vmul.f32 %v3187_v50, %v2828_v6 }
 0x507   :  { %v3189_v53 = vpop.eup %3188 }
 0x508   :  { %v3191_v36 = vpop.eup %3190  ;;  %v2817_v17 = vmul.f32 0.6931472, %v3189_v53 }
 0x509   :  { %v2826_v54 = vmul.f32 0.6931472, %v3191_v36 }
 0x50a   :  { %v2823_v60 = vsel %vm2822_vm3, %v2820_v55, %v2817_v17 }
 0x50b   :  { %v2833_v3 = vadd.f32 %v2823_v60, %v2805_v57  ;;  %v2832_v4 = vsel %vm2831_vm4, %v2829_v58, %v2826_v54 }
 0x50c   :  { %v2834_v11 = vadd.f32 %v2832_v4, %v2806_v0 }
 0x50d   :  { %2835 = vst [vmem:[%s3789_s2] sm:$0xff] %v2833_v3 }
 0x50e   :  { %2836 = vst [vmem:[%s3789_s2 + $0x8] sm:$0xff] %v2834_v11 }

</bundles_post_ra>
